<compile_context>
chip_gen: v7x
topology: tpu7x:2x2x1
jax: 0.10.0
libtpu: 0.0.40
codegen_flags: <defaults>
</compile_context>

<pallas_src>
import functools

import jax
import jax.numpy as jnp
from jax import lax
from jax.experimental import pallas as pl
from jax.experimental.pallas import tpu as pltpu

EMBEDDING_DIM = 384
HIDDEN_DIM = 512
NUM_CLASSES = 4
PADDED_CLASSES = 128          # lane-dense fc2 output width (multiple of 128)
EPS = 1e-12                   # torch F.normalize default eps


def lmhead_kernel(x_ref, w1_ref, b1_ref, w2_ref, b2_ref, embd_ref, pred_ref):
    # x_ref:  (TB, E)  bf16      w1_ref: (E, H)  bf16     b1_ref: (1, H)  f32
    # w2_ref: (H, Cp)  bf16      b2_ref: (1, Cp) f32
    # fc1 on the MXU: bf16 operands, f32 accumulation
    h = jnp.dot(x_ref[...], w1_ref[...],
                preferred_element_type=jnp.float32) + b1_ref[...]

    # F.normalize(p=2, dim=1) in f32:
    #   h / max(||h||, eps)  ==  h * rsqrt(max(||h||^2, eps^2))
    sq = jnp.sum(h * h, axis=1, keepdims=True)             # (TB, 1)  XLU reduce
    inv = lax.rsqrt(jnp.maximum(sq, EPS * EPS))             # EUP slot
    e = h * inv
    embd_ref[...] = e.astype(embd_ref.dtype)

    # fc2 on the MXU: bf16 operands, f32 accumulation, lane-dense (padded) output
    p = jnp.dot(e.astype(jnp.bfloat16), w2_ref[...],
                preferred_element_type=jnp.float32) + b2_ref[...]
    pred_ref[...] = p.astype(pred_ref.dtype)


def _round_up(n, m):
    return ((n + m - 1) // m) * m


def prepare_params(w1, b1, w2, b2):
    """One-time weight prep, hoisted out of the per-call path.

    PyTorch layout in:  w1 (H, E), b1 (H,), w2 (C, H), b2 (C,)
    Kernel layout out:  w1_t (E, H) bf16, b1 (1, H) f32,
                        w2_t (H, 128) bf16 zero-padded, b2 (1, 128) f32 zero-padded.
    """
    H, E = w1.shape
    C = w2.shape[0]
    w1_t = jnp.asarray(w1).T.astype(jnp.bfloat16)                         # (E, H)
    b1_2d = jnp.asarray(b1).reshape(1, H).astype(jnp.float32)             # (1, H)
    w2_t = jnp.zeros((H, PADDED_CLASSES), jnp.bfloat16)
    w2_t = w2_t.at[:, :C].set(jnp.asarray(w2).T.astype(jnp.bfloat16))     # (H, 128)
    b2_2d = jnp.zeros((1, PADDED_CLASSES), jnp.float32)
    b2_2d = b2_2d.at[:, :C].set(jnp.asarray(b2).astype(jnp.float32))      # (1, 128)
    return (w1_t, b1_2d, w2_t, b2_2d, C)


@functools.partial(jax.jit, static_argnames=("block_b", "num_classes"))
def _lm_head_forward_impl(x, w1_t, b1, w2_t, b2, *, block_b, num_classes):
    B, E = x.shape
    H = w1_t.shape[1]
    Cp = w2_t.shape[1]

    # Batch tile: big by default (512) for MXU / HBM efficiency, capped by the
    # (8-rounded) batch.  If the whole batch would be one grid step and the batch
    # is large, split into 2 steps so the parallel axis can shard across v7x's 2 TCs.
    blk = min(block_b, _round_up(B, 8))
    if B > 256 and pl.cdiv(B, blk) < 2:
        blk = _round_up(pl.cdiv(B, 2), 8)
    Bp = _round_up(B, blk)

    xb = x.astype(jnp.bfloat16)                 # halves x HBM->VMEM traffic
    if Bp != B:
        xb = jnp.pad(xb, ((0, Bp - B), (0, 0)))

    # Per-step VMEM: double-buffered x / embd / pred tiles + resident weights.
    # Only raise the scoped-VMEM limit when a big tile needs it (v5e default 16 MiB,
    # v7x physical 64 MiB).
    tile_bytes = (2 * blk * (E * 2 + H * 4 + Cp * 4)
                  + E * H * 2 + H * Cp * 2 + (H + Cp) * 4)
    vmem_limit = None
    if tile_bytes > 12 * 1024 * 1024:
        vmem_limit = min(2 * tile_bytes, 48 * 1024 * 1024)

    embd, pred = pl.pallas_call(
        lmhead_kernel,
        out_shape=(
            jax.ShapeDtypeStruct((Bp, H), jnp.float32),
            jax.ShapeDtypeStruct((Bp, Cp), jnp.float32),
        ),
        grid_spec=pltpu.PrefetchScalarGridSpec(
            num_scalar_prefetch=0,
            grid=(Bp // blk,),
            in_specs=[
                pl.BlockSpec((blk, E), lambda i: (i, 0)),   # x tile (bf16)
                pl.BlockSpec((E, H), lambda i: (0, 0)),     # w1^T (resident)
                pl.BlockSpec((1, H), lambda i: (0, 0)),     # b1
                pl.BlockSpec((H, Cp), lambda i: (0, 0)),    # w2^T padded (resident)
                pl.BlockSpec((1, Cp), lambda i: (0, 0)),    # b2 padded
            ],
            out_specs=[
                pl.BlockSpec((blk, H), lambda i: (i, 0)),   # embd tile
                pl.BlockSpec((blk, Cp), lambda i: (i, 0)),  # pred tile (lane-dense 128)
            ],
        ),
        compiler_params=pltpu.CompilerParams(
            dimension_semantics=("parallel",),
            vmem_limit_bytes=vmem_limit,
        ),
    )(xb, w1_t, b1, w2_t, b2)

    return embd[:B], pred[:B, :num_classes]


def lm_head_forward(x, params, *, block_b=512):
    """x: (B, E) float32. params: output of prepare_params()."""
    w1_t, b1, w2_t, b2, num_classes = params
    return _lm_head_forward_impl(x, w1_t, b1, w2_t, b2,
                                 block_b=block_b, num_classes=num_classes)


def init_params(key):
    """Deterministic init mimicking PyTorch Linear default (uniform +-1/sqrt(fan_in))."""
    k1, k2, k3, k4 = jax.random.split(key, 4)
    bound1 = 1.0 / (EMBEDDING_DIM ** 0.5)
    bound2 = 1.0 / (HIDDEN_DIM ** 0.5)
    w1 = jax.random.uniform(k1, (HIDDEN_DIM, EMBEDDING_DIM), jnp.float32, -bound1, bound1)
    b1 = jax.random.uniform(k2, (HIDDEN_DIM,), jnp.float32, -bound1, bound1)
    w2 = jax.random.uniform(k3, (NUM_CLASSES, HIDDEN_DIM), jnp.float32, -bound2, bound2)
    b2 = jax.random.uniform(k4, (NUM_CLASSES,), jnp.float32, -bound2, bound2)
    return w1, b1, w2, b2


def reference_f32(x, w1, b1, w2, b2):
    """Pure f32 reference matching the PyTorch module semantics."""
    h = x @ w1.T + b1
    norm = jnp.maximum(jnp.sqrt(jnp.sum(h * h, axis=1, keepdims=True)), EPS)
    e = h / norm
    p = e @ w2.T + b2
    return e, p


def reference_bf16(x, w1, b1, w2, b2):
    """Reference mimicking the kernel's bf16-operand / f32-accumulate numerics."""
    h = jnp.dot(x.astype(jnp.bfloat16), w1.T.astype(jnp.bfloat16),
                preferred_element_type=jnp.float32) + b1
    inv = lax.rsqrt(jnp.maximum(jnp.sum(h * h, axis=1, keepdims=True), EPS * EPS))
    e = h * inv
    p = jnp.dot(e.astype(jnp.bfloat16), w2.T.astype(jnp.bfloat16),
                preferred_element_type=jnp.float32) + b2
    return e, p


if __name__ == "__main__":
    key = jax.random.PRNGKey(0)
    kx, kp = jax.random.split(key)

    B = 8  # small batch for the sanity run (kernel auto-caps the tile size)
    x = jax.random.normal(kx, (B, EMBEDDING_DIM), jnp.float32)
    w1, b1, w2, b2 = init_params(kp)

    params = prepare_params(w1, b1, w2, b2)           # one-time weight prep (hoisted)
    embd, pred = lm_head_forward(x, params)
    jax.block_until_ready((embd, pred))

    assert embd.shape == (B, HIDDEN_DIM) and pred.shape == (B, NUM_CLASSES)

    # Tight check vs a bf16-consistent reference, loose check vs the exact f32 reference.
    e_bf, p_bf = reference_bf16(x, w1, b1, w2, b2)
    e_f32, p_f32 = reference_f32(x, w1, b1, w2, b2)
    assert jnp.allclose(embd, e_bf, atol=1e-3, rtol=1e-3)
    assert jnp.allclose(pred, p_bf, atol=1e-3, rtol=1e-3)
    assert jnp.allclose(embd, e_f32, atol=3e-2, rtol=3e-2)
    assert jnp.allclose(pred, p_f32, atol=3e-2, rtol=3e-2)

    print("KERNEL_OK")
</pallas_src>

<mosaic_0001>
module attributes {stable_mosaic.version = 11 : i64} {
  func.func @lmhead_kernel(%arg0: i32, %arg1: memref<8x384xbf16, #tpu.memory_space<vmem>>, %arg2: memref<384x512xbf16, #tpu.memory_space<vmem>>, %arg3: memref<1x512xf32, #tpu.memory_space<vmem>>, %arg4: memref<512x128xbf16, #tpu.memory_space<vmem>>, %arg5: memref<1x128xf32, #tpu.memory_space<vmem>>, %arg6: memref<8x512xf32, #tpu.memory_space<vmem>>, %arg7: memref<8x128xf32, #tpu.memory_space<vmem>>) attributes {dimension_semantics = [#tpu.dimension_semantics<parallel>], iteration_bounds = array<i64: 1>, scalar_prefetch = 0 : i64, scratch_operands = 0 : i64, tpu.core_type = #tpu.core_type<tc>, window_params = [{transform_indices = @transform_0, window_bounds = array<i64: 8, 384>}, {pipeline_mode = #tpu.pipeline_mode<synchronous>, transform_indices = @transform_1, window_bounds = array<i64: 384, 512>}, {pipeline_mode = #tpu.pipeline_mode<synchronous>, transform_indices = @transform_2, window_bounds = array<i64: 1, 512>}, {pipeline_mode = #tpu.pipeline_mode<synchronous>, transform_indices = @transform_3, window_bounds = array<i64: 512, 128>}, {pipeline_mode = #tpu.pipeline_mode<synchronous>, transform_indices = @transform_4, window_bounds = array<i64: 1, 128>}, {transform_indices = @transform_5, window_bounds = array<i64: 8, 512>}, {transform_indices = @transform_6, window_bounds = array<i64: 8, 128>}]} {
    %c0 = arith.constant 0 : index
    %c0_0 = arith.constant 0 : index
    %0 = vector.load %arg1[%c0, %c0_0] : memref<8x384xbf16, #tpu.memory_space<vmem>>, vector<8x384xbf16>
    %c0_1 = arith.constant 0 : index
    %c0_2 = arith.constant 0 : index
    %1 = vector.load %arg2[%c0_1, %c0_2] : memref<384x512xbf16, #tpu.memory_space<vmem>>, vector<384x512xbf16>
    %cst = arith.constant dense<0.000000e+00> : vector<8x512xf32>
    %2 = tpu.matmul %0, %1, %cst {dimension_numbers = #tpu.dot_dimension_numbers<[1], [0], [0], [1], [0, 0, 1, 1], [], []>} : vector<8x384xbf16>, vector<384x512xbf16>, vector<8x512xf32> -> vector<8x512xf32>
    %c0_3 = arith.constant 0 : index
    %c0_4 = arith.constant 0 : index
    %3 = vector.load %arg3[%c0_3, %c0_4] : memref<1x512xf32, #tpu.memory_space<vmem>>, vector<1x512xf32>
    %4 = vector.broadcast %3 : vector<1x512xf32> to vector<8x512xf32>
    %5 = arith.addf %2, %4 : vector<8x512xf32>
    %6 = arith.mulf %5, %5 : vector<8x512xf32>
    %cst_5 = arith.constant dense<0.000000e+00> : vector<8xf32>
    %7 = vector.multi_reduction <add>, %6, %cst_5 [1] : vector<8x512xf32> to vector<8xf32>
    %8 = vector.shape_cast %7 : vector<8xf32> to vector<8x1xf32>
    %cst_6 = arith.constant 1.000000e-24 : f32
    %9 = vector.broadcast %cst_6 : f32 to vector<8x1xf32>
    %10 = arith.maximumf %8, %9 : vector<8x1xf32>
    %11 = math.rsqrt %10 : vector<8x1xf32>
    %12 = vector.broadcast %11 : vector<8x1xf32> to vector<8x512xf32>
    %13 = arith.mulf %5, %12 : vector<8x512xf32>
    %c0_7 = arith.constant 0 : index
    %c0_8 = arith.constant 0 : index
    %14 = vector.load %arg6[%c0_7, %c0_8] : memref<8x512xf32, #tpu.memory_space<vmem>>, vector<8x512xf32>
    tpu.vector_store %arg6[%c0_7, %c0_8], %13 {strides = array<i32>} : memref<8x512xf32, #tpu.memory_space<vmem>>, vector<8x512xf32>,
    %15 = arith.truncf %13 : vector<8x512xf32> to vector<8x512xbf16>
    %c0_9 = arith.constant 0 : index
    %c0_10 = arith.constant 0 : index
    %16 = vector.load %arg4[%c0_9, %c0_10] : memref<512x128xbf16, #tpu.memory_space<vmem>>, vector<512x128xbf16>
    %cst_11 = arith.constant dense<0.000000e+00> : vector<8x128xf32>
    %17 = tpu.matmul %15, %16, %cst_11 {dimension_numbers = #tpu.dot_dimension_numbers<[1], [0], [0], [1], [0, 0, 1, 1], [], []>} : vector<8x512xbf16>, vector<512x128xbf16>, vector<8x128xf32> -> vector<8x128xf32>
    %c0_12 = arith.constant 0 : index
    %c0_13 = arith.constant 0 : index
    %18 = vector.load %arg5[%c0_12, %c0_13] : memref<1x128xf32, #tpu.memory_space<vmem>>, vector<1x128xf32>
    %19 = vector.broadcast %18 : vector<1x128xf32> to vector<8x128xf32>
    %20 = arith.addf %17, %19 : vector<8x128xf32>
    %c0_14 = arith.constant 0 : index
    %c0_15 = arith.constant 0 : index
    %21 = vector.load %arg7[%c0_14, %c0_15] : memref<8x128xf32, #tpu.memory_space<vmem>>, vector<8x128xf32>
    tpu.vector_store %arg7[%c0_14, %c0_15], %20 {strides = array<i32>} : memref<8x128xf32, #tpu.memory_space<vmem>>, vector<8x128xf32>,
    return
  }
  func.func @transform_0(%arg0: i32) -> (i32, i32) {
    %c0_i32 = arith.constant 0 : i32
    %c0_i32_0 = arith.constant 0 : i32
    return %arg0, %c0_i32 : i32, i32
  }
  func.func @transform_1(%arg0: i32) -> (i32, i32) {
    %c0_i32 = arith.constant 0 : i32
    %c0_i32_0 = arith.constant 0 : i32
    %c0_i32_1 = arith.constant 0 : i32
    return %c0_i32, %c0_i32_0 : i32, i32
  }
  func.func @transform_2(%arg0: i32) -> (i32, i32) {
    %c0_i32 = arith.constant 0 : i32
    %c0_i32_0 = arith.constant 0 : i32
    %c0_i32_1 = arith.constant 0 : i32
    return %c0_i32, %c0_i32_0 : i32, i32
  }
  func.func @transform_3(%arg0: i32) -> (i32, i32) {
    %c0_i32 = arith.constant 0 : i32
    %c0_i32_0 = arith.constant 0 : i32
    %c0_i32_1 = arith.constant 0 : i32
    return %c0_i32, %c0_i32_0 : i32, i32
  }
  func.func @transform_4(%arg0: i32) -> (i32, i32) {
    %c0_i32 = arith.constant 0 : i32
    %c0_i32_0 = arith.constant 0 : i32
    %c0_i32_1 = arith.constant 0 : i32
    return %c0_i32, %c0_i32_0 : i32, i32
  }
  func.func @transform_5(%arg0: i32) -> (i32, i32) {
    %c0_i32 = arith.constant 0 : i32
    %c0_i32_0 = arith.constant 0 : i32
    return %arg0, %c0_i32 : i32, i32
  }
  func.func @transform_6(%arg0: i32) -> (i32, i32) {
    %c0_i32 = arith.constant 0 : i32
    %c0_i32_0 = arith.constant 0 : i32
    return %arg0, %c0_i32 : i32, i32
  }
}

</mosaic_0001>

<bundles_post_ra>
// kernel: _lm_head_forward_impl.1
= control target key start
LH: loop header
LB: loop body
LE: loop exit
PB: predicated region body
PF: predicated region fallthrough
CT: control target
= control target key end

     0   :  { %12 = vsyncpa [#allocation3], 0  ;;  %s1757_s0 = inlined_call_operand.vmem [shape: bf16[8,384], index: 0, kind: input, shape index: {}]   ;;  %s1758_s1 = inlined_call_operand.hbm [shape: bf16[384,512], index: 1, kind: input, shape index: {}]   ;;  %s1759_s2 = inlined_call_operand.vmem [shape: f32[1,512], index: 2, kind: input, shape index: {}]   ;;  %s1760_s3 = inlined_call_operand.hbm [shape: bf16[512,128], index: 3, kind: input, shape index: {}]   ;;  %s1761_s4 = inlined_call_operand.vmem [shape: f32[1,128], index: 4, kind: input, shape index: {}]   ;;  %s1762_s5 = inlined_call_operand.hbm [shape: f32[8,512], index: 5, kind: output, shape index: {0}]   ;;  %s1763_s6 = inlined_call_operand.vmem [shape: f32[8,128], index: 6, kind: output, shape index: {1}]  }
   0x1   :  { %13 = vsyncpa [#allocation6], 0 }
   0x2   :  { %14 = vsyncpa [#allocation4], 0  ;;  %s1663_s21 = smov [#allocation2]   ;;  %s1591_s25 = scalar_lea.hbm %s1758_s1, 12288 }
   0x3   :  { %s22_s22 = sshll.u32 %s1663_s21, 4  ;;  %p1592_p0 = scmp.ne.s32.totalorder %s1758_s1, %s1591_s25  ;;  %s23_s22 = int_to_ptr.vmem [resolvable:$true] %s22_s22 }
   0x4   :  { %p1595_p1 = scmp.lt.u32.totalorder %s1591_s25, %s1758_s1 }
   0x6   :  { %p1597_p2 = pnand %p1595_p1, %p1592_p0 }
   0x8   :  { %1600 = shalt.err (!%p1597_p2)
}
   0x9   :  { %s1601_s30 = scalar_lea.vmem %s23_s22, 12288  ;;  %p1606_p4 = scmp.lt.s32.totalorder %s23_s22, %s23_s22 }
   0xa   :  { %p1602_p3 = scmp.ne.s32.totalorder %s23_s22, %s1601_s30  ;;  %p1607_p5 = scmp.lt.s32.totalorder %s1601_s30, %s1601_s30 }
   0xc   :  { %p1608_p6 = por %p1607_p5, %p1606_p4 }
   0xe   :  { %p1609_p7 = pnand %p1608_p6, %p1602_p3 }
  0x10   :  { %1612 = shalt.err (!%p1609_p7)
}
  0x11   :  { %s1664_s7 = smov 256   ;;  %s1665_s8 = smov 16  }
  0x12   :  { %28 = dma.hbm_to_vmem [thread:$0]  %s1758_s1, 12288, %s23_s22, [#allocation3], %s1664_s7, %s1664_s7, %s1665_s8  }
  0x13   :  { %s1666_s11 = smov [#allocation5]   ;;  %s1613_s15 = scalar_lea.hbm %s1760_s3, 4096 }
  0x14   :  { %s36_s12 = sshll.u32 %s1666_s11, 4  ;;  %p1614_p8 = scmp.ne.s32.totalorder %s1760_s3, %s1613_s15  ;;  %s37_s12 = int_to_ptr.vmem [resolvable:$true] %s36_s12 }
  0x15   :  { %p1617_p9 = scmp.lt.u32.totalorder %s1613_s15, %s1760_s3 }
  0x17   :  { %p1619_p10 = pnand %p1617_p9, %p1614_p8 }
  0x19   :  { %1622 = shalt.err (!%p1619_p10)
}
  0x1a   :  { %s1623_s20 = scalar_lea.vmem %s37_s12, 4096  ;;  %p1628_p12 = scmp.lt.s32.totalorder %s37_s12, %s37_s12 }
  0x1b   :  { %p1624_p11 = scmp.ne.s32.totalorder %s37_s12, %s1623_s20  ;;  %p1629_p13 = scmp.lt.s32.totalorder %s1623_s20, %s1623_s20 }
  0x1d   :  { %p1630_p0 = por %p1629_p13, %p1628_p12 }
  0x1f   :  { %p1631_p1 = pnand %p1630_p0, %p1624_p11 }
  0x21   :  { %1634 = shalt.err (!%p1631_p1)
}
  0x22   :  { %s1667_s1 = smov 64   ;;  %s1668_s21 = smov 4  }
  0x23   :  { %42 = dma.hbm_to_vmem [thread:$0]  %s1760_s3, 4096, %s37_s12, [#allocation6], %s1667_s1, %s1667_s1, %s1668_s21  }
  0x24   :  { %1657 = dma.done.wait [#allocation3], 12288  }
  0x25   :  { %1658 = vsyncadd [#allocation3], 4294955008 }
  0x26   :  { %1659 = dma.done.wait [#allocation6], 4096  }
  0x27   :  { %1660 = vsyncadd [#allocation6], 4294963200  ;;  %v1410_v0 = vld [vmem:[#allocation2 + $0x4] ss:$16 sps:$4 sm:$0xff]   ;;  %v1412_v1 = vld [vmem:[#allocation2 + $0xc] ss:$16 sps:$4 sm:$0xff]  }
  0x28   :  { %663 = vmatprep.subr.bf16.mxu0 %v1410_v0  ;;  %v1414_v2 = vld [vmem:[#allocation2] ss:$16 sps:$4 sm:$0xff]   ;;  %v1415_v3 = vld [vmem:[#allocation2 + $0x8] ss:$16 sps:$4 sm:$0xff]   ;;  %745 = vmatprep.subr.bf16.mxu1 %v1412_v1  ;;  %v1416_v4 = vld [vmem:[#allocation2 + $0x24] ss:$16 sps:$4 sm:$0xff]  }
  0x29   :  { %664 = vmatpush1.bf16.msra.mxu0 %v1414_v2  ;;  %746 = vmatpush1.bf16.msra.mxu1 %v1415_v3  ;;  %v1418_v5 = vld [vmem:[#allocation2 + $0x2c] ss:$16 sps:$4 sm:$0xff]   ;;  %v1420_v6 = vld [vmem:[#allocation2 + $0x20] ss:$16 sps:$4 sm:$0xff]   ;;  %v1421_v7 = vld [vmem:[#allocation2 + $0x28] ss:$16 sps:$4 sm:$0xff]  }
  0x2a   :  { %665 = vmatprep.subr.bf16.mxu0 %v1416_v4  ;;  %747 = vmatprep.subr.bf16.mxu1 %v1418_v5  ;;  %v1422_v8 = vld [vmem:[#allocation2 + $0x44] ss:$16 sps:$4 sm:$0xff]   ;;  %v1424_v9 = vld [vmem:[#allocation2 + $0x4c] ss:$16 sps:$4 sm:$0xff]   ;;  %v1426_v10 = vld [vmem:[#allocation2 + $0x40] ss:$16 sps:$4 sm:$0xff]  }
  0x2b   :  { %v1427_v11 = vld [vmem:[#allocation2 + $0x48] ss:$16 sps:$4 sm:$0xff]   ;;  %v1428_v12 = vld [vmem:[#allocation2 + $0x64] ss:$16 sps:$4 sm:$0xff]   ;;  %v1430_v13 = vld [vmem:[#allocation2 + $0x6c] ss:$16 sps:$4 sm:$0xff]  }
  0x2c   :  { %v1432_v14 = vld [vmem:[#allocation2 + $0x60] ss:$16 sps:$4 sm:$0xff]   ;;  %v1433_v15 = vld [vmem:[#allocation2 + $0x68] ss:$16 sps:$4 sm:$0xff]   ;;  %v1434_v16 = vld [vmem:[#allocation2 + $0x84] ss:$16 sps:$4 sm:$0xff]  }
  0x2d   :  { %666 = vmatpush1.bf16.msra.mxu0 %v1420_v6  ;;  %748 = vmatpush1.bf16.msra.mxu1 %v1421_v7  ;;  %v1436_v17 = vld [vmem:[#allocation2 + $0x8c] ss:$16 sps:$4 sm:$0xff]   ;;  %v1438_v18 = vld [vmem:[#allocation2 + $0x80] ss:$16 sps:$4 sm:$0xff]   ;;  %v1439_v19 = vld [vmem:[#allocation2 + $0x88] ss:$16 sps:$4 sm:$0xff]  }
  0x2e   :  { %667 = vmatprep.subr.bf16.mxu0 %v1422_v8  ;;  %749 = vmatprep.subr.bf16.mxu1 %v1424_v9  ;;  %v1440_v20 = vld [vmem:[#allocation2 + $0xa4] ss:$16 sps:$4 sm:$0xff]   ;;  %v1442_v21 = vld [vmem:[#allocation2 + $0xac] ss:$16 sps:$4 sm:$0xff]   ;;  %v1444_v22 = vld [vmem:[#allocation2 + $0xa0] ss:$16 sps:$4 sm:$0xff]  }
  0x2f   :  { %v1445_v23 = vld [vmem:[#allocation2 + $0xa8] ss:$16 sps:$4 sm:$0xff]   ;;  %v1446_v24 = vld [vmem:[#allocation2 + $0xc4] ss:$16 sps:$4 sm:$0xff]   ;;  %v1448_v25 = vld [vmem:[#allocation2 + $0xcc] ss:$16 sps:$4 sm:$0xff]  }
  0x30   :  { %v1450_v26 = vld [vmem:[#allocation2 + $0xc0] ss:$16 sps:$4 sm:$0xff]   ;;  %v1451_v27 = vld [vmem:[#allocation2 + $0xc8] ss:$16 sps:$4 sm:$0xff]   ;;  %v1452_v28 = vld [vmem:[#allocation2 + $0xe4] ss:$16 sps:$4 sm:$0xff]  }
  0x31   :  { %668 = vmatpush1.bf16.msra.mxu0 %v1426_v10  ;;  %750 = vmatpush1.bf16.msra.mxu1 %v1427_v11  ;;  %v1454_v29 = vld [vmem:[#allocation2 + $0xec] ss:$16 sps:$4 sm:$0xff]   ;;  %v1456_v30 = vld [vmem:[#allocation2 + $0xe0] ss:$16 sps:$4 sm:$0xff]   ;;  %v1457_v31 = vld [vmem:[#allocation2 + $0xe8] ss:$16 sps:$4 sm:$0xff]  }
  0x32   :  { %669 = vmatprep.subr.bf16.mxu0 %v1428_v12  ;;  %751 = vmatprep.subr.bf16.mxu1 %v1430_v13  ;;  %v1458_v32 = vld [vmem:[#allocation2 + $0x104] ss:$16 sps:$4 sm:$0xff]   ;;  %v1460_v33 = vld [vmem:[#allocation2 + $0x10c] ss:$16 sps:$4 sm:$0xff]   ;;  %v1462_v34 = vld [vmem:[#allocation2 + $0x100] ss:$16 sps:$4 sm:$0xff]  }
  0x33   :  { %v1463_v35 = vld [vmem:[#allocation2 + $0x108] ss:$16 sps:$4 sm:$0xff]   ;;  %v1464_v36 = vld [vmem:[#allocation2 + $0x124] ss:$16 sps:$4 sm:$0xff]   ;;  %v1466_v37 = vld [vmem:[#allocation2 + $0x12c] ss:$16 sps:$4 sm:$0xff]  }
  0x34   :  { %v1468_v38 = vld [vmem:[#allocation2 + $0x120] ss:$16 sps:$4 sm:$0xff]   ;;  %v1469_v39 = vld [vmem:[#allocation2 + $0x128] ss:$16 sps:$4 sm:$0xff]   ;;  %v1470_v40 = vld [vmem:[#allocation2 + $0x144] ss:$16 sps:$4 sm:$0xff]  }
  0x35   :  { %670 = vmatpush1.bf16.msra.mxu0 %v1432_v14  ;;  %752 = vmatpush1.bf16.msra.mxu1 %v1433_v15  ;;  %v1472_v41 = vld [vmem:[#allocation2 + $0x14c] ss:$16 sps:$4 sm:$0xff]   ;;  %v1474_v42 = vld [vmem:[#allocation2 + $0x140] ss:$16 sps:$4 sm:$0xff]   ;;  %v1475_v43 = vld [vmem:[#allocation2 + $0x148] ss:$16 sps:$4 sm:$0xff]  }
  0x36   :  { %671 = vmatprep.subr.bf16.mxu0 %v1434_v16  ;;  %753 = vmatprep.subr.bf16.mxu1 %v1436_v17  ;;  %v1476_v44 = vld [vmem:[#allocation2 + $0x164] ss:$16 sps:$4 sm:$0xff]   ;;  %v1478_v45 = vld [vmem:[#allocation2 + $0x16c] ss:$16 sps:$4 sm:$0xff]   ;;  %v1480_v47 = vld [vmem:[#allocation2 + $0x160] ss:$16 sps:$4 sm:$0xff]  }
  0x37   :  { %v52_v46 = vld [vmem:[%s1757_s0] sm:$0xff]  ;;  %v1481_v49 = vld [vmem:[#allocation2 + $0x168] ss:$16 sps:$4 sm:$0xff]   ;;  %v1484_v51 = vld [vmem:[#allocation2 + $0x18c] ss:$16 sps:$4 sm:$0xff]   ;;  %v1669_v15 = vmov 0  }
  0x38   :  { %v1215_v48 = vcombine.high %v52_v46, %v52_v46  ;;  %v1482_v50 = vld [vmem:[#allocation2 + $0x184] ss:$16 sps:$4 sm:$0xff]   ;;  %v1486_v52 = vld [vmem:[#allocation2 + $0x180] ss:$16 sps:$4 sm:$0xff]   ;;  %v1487_v53 = vld [vmem:[#allocation2 + $0x188] ss:$16 sps:$4 sm:$0xff]   ;;  %v1214_v4 = vcombine.low %v52_v46, %v52_v46 }
  0x39   :  { %672 = vmatpush1.bf16.msra.mxu0 %v1438_v18  ;;  %754 = vmatpush1.bf16.msra.mxu1 %v1439_v19  ;;  %v1488_v54 = vld [vmem:[#allocation2 + $0x1a4] ss:$16 sps:$4 sm:$0xff]   ;;  %v1490_v55 = vld [vmem:[#allocation2 + $0x1ac] ss:$16 sps:$4 sm:$0xff]   ;;  %v1492_v56 = vld [vmem:[#allocation2 + $0x1a0] ss:$16 sps:$4 sm:$0xff]  }
  0x3a   :  { %673 = vmatprep.subr.bf16.mxu0 %v1440_v20  ;;  %755 = vmatprep.subr.bf16.mxu1 %v1442_v21  ;;  %v1493_v57 = vld [vmem:[#allocation2 + $0x1a8] ss:$16 sps:$4 sm:$0xff]   ;;  %v1494_v58 = vld [vmem:[#allocation2 + $0x1c4] ss:$16 sps:$4 sm:$0xff]   ;;  %v1496_v59 = vld [vmem:[#allocation2 + $0x1cc] ss:$16 sps:$4 sm:$0xff]  }
  0x3b   :  { %695 = vmatprep.mubr.bf16.mxu0 %v1215_v48  ;;  %777 = vmatprep.mubr.bf16.mxu1 %v1215_v48  ;;  %v1498_v60 = vld [vmem:[#allocation2 + $0x1c0] ss:$16 sps:$4 sm:$0xff]   ;;  %v1499_v61 = vld [vmem:[#allocation2 + $0x1c8] ss:$16 sps:$4 sm:$0xff]   ;;  %v1500_v62 = vld [vmem:[#allocation2 + $0x1e4] ss:$16 sps:$4 sm:$0xff]  }
  0x3c   :  { %v1502_v63 = vld [vmem:[#allocation2 + $0x1ec] ss:$16 sps:$4 sm:$0xff]   ;;  %v1504_v0 = vld [vmem:[#allocation2 + $0x1e0] ss:$16 sps:$4 sm:$0xff]   ;;  %v1505_v1 = vld [vmem:[#allocation2 + $0x1e8] ss:$16 sps:$4 sm:$0xff]  }
  0x3d   :  { %674 = vmatpush1.bf16.msra.mxu0 %v1444_v22  ;;  %756 = vmatpush1.bf16.msra.mxu1 %v1445_v23  ;;  %v1510_v2 = vld [vmem:[#allocation2 + $0x204] ss:$16 sps:$4 sm:$0xff]   ;;  %v1513_v3 = vld [vmem:[#allocation2 + $0x20c] ss:$16 sps:$4 sm:$0xff]   ;;  %v1508_v5 = vld [vmem:[#allocation2 + $0x200] ss:$16 sps:$4 sm:$0xff]  }
  0x3e   :  { %675 = vmatprep.subr.bf16.mxu0 %v1446_v24  ;;  %757 = vmatprep.subr.bf16.mxu1 %v1448_v25  ;;  %v1511_v6 = vld [vmem:[#allocation2 + $0x208] ss:$16 sps:$4 sm:$0xff]   ;;  %v1516_v7 = vld [vmem:[#allocation2 + $0x224] ss:$16 sps:$4 sm:$0xff]   ;;  %v1519_v8 = vld [vmem:[#allocation2 + $0x22c] ss:$16 sps:$4 sm:$0xff]  }
  0x3f   :  { %v1514_v9 = vld [vmem:[#allocation2 + $0x220] ss:$16 sps:$4 sm:$0xff]   ;;  %v1517_v10 = vld [vmem:[#allocation2 + $0x228] ss:$16 sps:$4 sm:$0xff]   ;;  %v1522_v11 = vld [vmem:[#allocation2 + $0x244] ss:$16 sps:$4 sm:$0xff]  }
  0x40   :  { %v1525_v12 = vld [vmem:[#allocation2 + $0x24c] ss:$16 sps:$4 sm:$0xff]   ;;  %v1520_v13 = vld [vmem:[#allocation2 + $0x240] ss:$16 sps:$4 sm:$0xff]   ;;  %v1523_v14 = vld [vmem:[#allocation2 + $0x248] ss:$16 sps:$4 sm:$0xff]  }
  0x41   :  { %676 = vmatpush1.bf16.msra.mxu0 %v1450_v26  ;;  %758 = vmatpush1.bf16.msra.mxu1 %v1451_v27  ;;  %v1528_v16 = vld [vmem:[#allocation2 + $0x264] ss:$16 sps:$4 sm:$0xff]   ;;  %v1531_v17 = vld [vmem:[#allocation2 + $0x26c] ss:$16 sps:$4 sm:$0xff]   ;;  %v1526_v18 = vld [vmem:[#allocation2 + $0x260] ss:$16 sps:$4 sm:$0xff]  }
  0x42   :  { %677 = vmatprep.subr.bf16.mxu0 %v1452_v28  ;;  %759 = vmatprep.subr.bf16.mxu1 %v1454_v29  ;;  %v1529_v19 = vld [vmem:[#allocation2 + $0x268] ss:$16 sps:$4 sm:$0xff]   ;;  %v1534_v20 = vld [vmem:[#allocation2 + $0x284] ss:$16 sps:$4 sm:$0xff]   ;;  %v1537_v21 = vld [vmem:[#allocation2 + $0x28c] ss:$16 sps:$4 sm:$0xff]  }
  0x43   :  { %v1532_v22 = vld [vmem:[#allocation2 + $0x280] ss:$16 sps:$4 sm:$0xff]   ;;  %v1535_v23 = vld [vmem:[#allocation2 + $0x288] ss:$16 sps:$4 sm:$0xff]   ;;  %v1540_v24 = vld [vmem:[#allocation2 + $0x2a4] ss:$16 sps:$4 sm:$0xff]  }
  0x44   :  { %v1543_v25 = vld [vmem:[#allocation2 + $0x2ac] ss:$16 sps:$4 sm:$0xff]   ;;  %v1538_v26 = vld [vmem:[#allocation2 + $0x2a0] ss:$16 sps:$4 sm:$0xff]   ;;  %v1541_v27 = vld [vmem:[#allocation2 + $0x2a8] ss:$16 sps:$4 sm:$0xff]  }
  0x45   :  { %678 = vmatpush1.bf16.msra.mxu0 %v1456_v30  ;;  %760 = vmatpush1.bf16.msra.mxu1 %v1457_v31  ;;  %v1546_v28 = vld [vmem:[#allocation2 + $0x2c4] ss:$16 sps:$4 sm:$0xff]   ;;  %v1549_v29 = vld [vmem:[#allocation2 + $0x2cc] ss:$16 sps:$4 sm:$0xff]   ;;  %v1544_v30 = vld [vmem:[#allocation2 + $0x2c0] ss:$16 sps:$4 sm:$0xff]  }
  0x46   :  { %679 = vmatprep.subr.bf16.mxu0 %v1458_v32  ;;  %761 = vmatprep.subr.bf16.mxu1 %v1460_v33  ;;  %v1547_v31 = vld [vmem:[#allocation2 + $0x2c8] ss:$16 sps:$4 sm:$0xff]   ;;  %v1552_v32 = vld [vmem:[#allocation2 + $0x2e4] ss:$16 sps:$4 sm:$0xff]   ;;  %v1555_v33 = vld [vmem:[#allocation2 + $0x2ec] ss:$16 sps:$4 sm:$0xff]  }
  0x47   :  { %v1566_v46 = vld [vmem:[#allocation5 + $0xd0] sm:$0xff]  }
  0x48   :  { %v1568_v48 = vld [vmem:[#allocation5 + $0x90] sm:$0xff]  }
  0x49   :  { %680 = vmatpush1.bf16.msra.mxu0 %v1462_v34  ;;  %762 = vmatpush1.bf16.msra.mxu1 %v1463_v35  ;;  %v1550_v34 = vld [vmem:[#allocation2 + $0x2e0] ss:$16 sps:$4 sm:$0xff]   ;;  %v1553_v35 = vld [vmem:[#allocation2 + $0x2e8] ss:$16 sps:$4 sm:$0xff]  }
  0x4a   :  { %681 = vmatprep.subr.bf16.mxu0 %v1464_v36  ;;  %763 = vmatprep.subr.bf16.mxu1 %v1466_v37  ;;  %v1556_v36 = vld [vmem:[%s1757_s0 + $0x8] ss:$0 sps:$4 sm:$0xff]   ;;  %v1557_v37 = vld [vmem:[#allocation5 + $0x40] sm:$0xff]  }
  0x4d   :  { %682 = vmatpush1.bf16.msra.mxu0 %v1468_v38  ;;  %764 = vmatpush1.bf16.msra.mxu1 %v1469_v39  ;;  %v1558_v38 = vld [vmem:[#allocation5 + $0xc0] sm:$0xff]  }
  0x4e   :  { %683 = vmatprep.subr.bf16.mxu0 %v1470_v40  ;;  %765 = vmatprep.subr.bf16.mxu1 %v1472_v41  ;;  %v1559_v39 = vld [vmem:[#allocation5] sm:$0xff]   ;;  %v1561_v41 = vld [vmem:[#allocation5 + $0x48] sm:$0xff]  }
  0x4f   :  { %v1560_v40 = vld [vmem:[#allocation5 + $0x80] sm:$0xff]  }
  0x51   :  { %684 = vmatpush1.bf16.msra.mxu0 %v1474_v42  ;;  %766 = vmatpush1.bf16.msra.mxu1 %v1475_v43  ;;  %v1562_v42 = vld [vmem:[#allocation5 + $0xc8] sm:$0xff]  }
  0x52   :  { %685 = vmatprep.subr.bf16.mxu0 %v1476_v44  ;;  %767 = vmatprep.subr.bf16.mxu1 %v1478_v45  ;;  %v1563_v43 = vld [vmem:[#allocation5 + $0x8] sm:$0xff]   ;;  %v1565_v45 = vld [vmem:[#allocation5 + $0x50] sm:$0xff]  }
  0x53   :  { %v1564_v44 = vld [vmem:[#allocation5 + $0x88] sm:$0xff]  }
  0x55   :  { %686 = vmatpush1.bf16.msra.mxu0 %v1480_v47  ;;  %768 = vmatpush1.bf16.msra.mxu1 %v1481_v49  ;;  %v1567_v47 = vld [vmem:[#allocation5 + $0x10] sm:$0xff]   ;;  %v1569_v49 = vld [vmem:[#allocation5 + $0x58] sm:$0xff]  }
  0x56   :  { %687 = vmatprep.subr.bf16.mxu0 %v1482_v50  ;;  %769 = vmatprep.subr.bf16.mxu1 %v1484_v51  ;;  %v1570_v50 = vld [vmem:[#allocation5 + $0xd8] sm:$0xff]   ;;  %v152_v51 = vlaneseq }
  0x59   :  { %688 = vmatpush1.bf16.msra.mxu0 %v1486_v52  ;;  %770 = vmatpush1.bf16.msra.mxu1 %v1487_v53  ;;  %v153_v52 = vshrl.u32 %v152_v51, 7 }
  0x5a   :  { %689 = vmatprep.subr.bf16.mxu0 %v1488_v54  ;;  %771 = vmatprep.subr.bf16.mxu1 %v1490_v55  ;;  %v150_v54 = vld [vmem:[%s1759_s2] sm:$0xf]  ;;  %s1670_s2 = smov [#allocation7]  }
  0x5b   :  { %v154_v53 = vsub.s32 0, %v153_v52  ;;  %v162_v55 = vsub.s32 2, %v153_v52  ;;  %s1200_s28 = sshll.u32 %s1670_s2, 4  ;;  %s1201_s28 = int_to_ptr.vmem [resolvable:$true] %s1200_s28 }
  0x5c   :  { %s1635_s29 = scalar_lea.vmem %s1201_s28, 512  ;;  %p1640_p3 = scmp.lt.s32.totalorder %s1201_s28, %s1201_s28 }
  0x5d   :  { %690 = vmatpush1.bf16.msra.mxu0 %v1492_v56  ;;  %772 = vmatpush1.bf16.msra.mxu1 %v1493_v57  ;;  %v158_v56 = vsub.s32 1, %v153_v52  ;;  %v166_v57 = vsub.s32 3, %v153_v52  ;;  %p1636_p2 = scmp.ne.s32.totalorder %s1201_s28, %s1635_s29  ;;  %p1641_p4 = scmp.lt.s32.totalorder %s1635_s29, %s1635_s29 }
  0x5e   :  { %691 = vmatprep.subr.bf16.mxu0 %v1494_v58  ;;  %773 = vmatprep.subr.bf16.mxu1 %v1496_v59  ;;  %v155_v58 = vrot.slane %v150_v54, %v154_v53  ;;  %v163_v59 = vrot.slane %v150_v54, %v162_v55 }
  0x5f   :  { %p1642_p5 = por %p1641_p4, %p1640_p3 }
  0x61   :  { %692 = vmatpush1.bf16.msra.mxu0 %v1498_v60  ;;  %774 = vmatpush1.bf16.msra.mxu1 %v1499_v61  ;;  %v159_v60 = vrot.slane %v150_v54, %v158_v56  ;;  %p1643_p6 = pnand %p1642_p5, %p1636_p2 }
  0x62   :  { %693 = vmatprep.subr.bf16.mxu0 %v1500_v62  ;;  %775 = vmatprep.subr.bf16.mxu1 %v1502_v63  ;;  %v167_v63 = vrot.slane %v150_v54, %v166_v57 }
  0x65   :  { %694 = vmatpush1.bf16.msra.mxu0 %v1504_v0  ;;  %776 = vmatpush1.bf16.msra.mxu1 %v1505_v1 }
  0x66   :  { %704 = vmatprep.subr.bf16.mxu0 %v1510_v2  ;;  %786 = vmatprep.subr.bf16.mxu1 %v1513_v3 }
  0x68   :  { %696 = vmatmul.mubr.bf16.vlgmr.msra.gmra.mrb[0].mxu0 %v1214_v4  ;;  %778 = vmatmul.mubr.bf16.vlgmr.msra.gmra.mrb[0].mxu1 %v1214_v4 }
  0x69   :  { %705 = vmatpush1.bf16.msra.mxu0 %v1508_v5  ;;  %787 = vmatpush1.bf16.msra.mxu1 %v1511_v6 }
  0x6a   :  { %706 = vmatprep.subr.bf16.mxu0 %v1516_v7  ;;  %788 = vmatprep.subr.bf16.mxu1 %v1519_v8 }
  0x6b   :  { %736 = vmatprep.mubr.bf16.mxu0 %v1669_v15  ;;  %818 = vmatprep.mubr.bf16.mxu1 %v1669_v15 }
  0x6d   :  { %707 = vmatpush1.bf16.msra.mxu0 %v1514_v9  ;;  %789 = vmatpush1.bf16.msra.mxu1 %v1517_v10 }
  0x6e   :  { %708 = vmatprep.subr.bf16.mxu0 %v1522_v11  ;;  %790 = vmatprep.subr.bf16.mxu1 %v1525_v12 }
  0x71   :  { %709 = vmatpush1.bf16.msra.mxu0 %v1520_v13  ;;  %791 = vmatpush1.bf16.msra.mxu1 %v1523_v14 }
  0x72   :  { %710 = vmatprep.subr.bf16.mxu0 %v1528_v16  ;;  %792 = vmatprep.subr.bf16.mxu1 %v1531_v17  ;;  %v1571_v17 = vld [vmem:[#allocation5 + $0x18] sm:$0xff]  }
  0x75   :  { %711 = vmatpush1.bf16.msra.mxu0 %v1526_v18  ;;  %793 = vmatpush1.bf16.msra.mxu1 %v1529_v19  ;;  %v1572_v18 = vld [vmem:[#allocation5 + $0x98] sm:$0xff]   ;;  %v1573_v19 = vld [vmem:[#allocation5 + $0x60] sm:$0xff]  }
  0x76   :  { %712 = vmatprep.subr.bf16.mxu0 %v1534_v20  ;;  %794 = vmatprep.subr.bf16.mxu1 %v1537_v21  ;;  %v1574_v20 = vld [vmem:[#allocation5 + $0xe0] sm:$0xff]  }
  0x77   :  { %v1575_v21 = vld [vmem:[#allocation5 + $0x20] sm:$0xff]  }
  0x79   :  { %713 = vmatpush1.bf16.msra.mxu0 %v1532_v22  ;;  %795 = vmatpush1.bf16.msra.mxu1 %v1535_v23  ;;  %v1576_v22 = vld [vmem:[#allocation5 + $0xa0] sm:$0xff]   ;;  %v1577_v23 = vld [vmem:[#allocation5 + $0x68] sm:$0xff]  }
  0x7a   :  { %714 = vmatprep.subr.bf16.mxu0 %v1540_v24  ;;  %796 = vmatprep.subr.bf16.mxu1 %v1543_v25  ;;  %v1578_v24 = vld [vmem:[#allocation5 + $0xe8] sm:$0xff]  }
  0x7b   :  { %v1579_v25 = vld [vmem:[#allocation5 + $0x28] sm:$0xff]  }
  0x7d   :  { %715 = vmatpush1.bf16.msra.mxu0 %v1538_v26  ;;  %797 = vmatpush1.bf16.msra.mxu1 %v1541_v27  ;;  %v1580_v26 = vld [vmem:[#allocation5 + $0xa8] sm:$0xff]   ;;  %v1581_v27 = vld [vmem:[#allocation5 + $0x70] sm:$0xff]  }
  0x7e   :  { %716 = vmatprep.subr.bf16.mxu0 %v1546_v28  ;;  %798 = vmatprep.subr.bf16.mxu1 %v1549_v29  ;;  %v1582_v28 = vld [vmem:[#allocation5 + $0xf0] sm:$0xff]  }
  0x7f   :  { %v1583_v29 = vld [vmem:[#allocation5 + $0x30] sm:$0xff]  }
  0x81   :  { %717 = vmatpush1.bf16.msra.mxu0 %v1544_v30  ;;  %799 = vmatpush1.bf16.msra.mxu1 %v1547_v31  ;;  %v1584_v30 = vld [vmem:[#allocation5 + $0xb0] sm:$0xff]   ;;  %v1585_v31 = vld [vmem:[#allocation5 + $0x78] sm:$0xff]  }
  0x82   :  { %718 = vmatprep.subr.bf16.mxu0 %v1552_v32  ;;  %800 = vmatprep.subr.bf16.mxu1 %v1555_v33  ;;  %v1586_v32 = vld [vmem:[#allocation5 + $0xf8] sm:$0xff]  }
  0x83   :  { %v1587_v33 = vld [vmem:[#allocation5 + $0x38] sm:$0xff]  }
  0x85   :  { %719 = vmatpush1.bf16.msra.mxu0 %v1550_v34  ;;  %801 = vmatpush1.bf16.msra.mxu1 %v1553_v35  ;;  %v1588_v34 = vld [vmem:[#allocation5 + $0xb8] sm:$0xff]  }
  0x86   :  { %1346 = vmatprep.subr.bf16.mxu0 %v1557_v37  ;;  %1368 = vmatprep.subr.bf16.mxu1 %v1558_v38 }
  0x88   :  { %737 = vmatmul.mubr.bf16.vlgmr.msra.gmra.mrb[0].mxu0 %v1556_v36  ;;  %819 = vmatmul.mubr.bf16.vlgmr.msra.gmra.mrb[0].mxu1 %v1556_v36 }
  0x89   :  { %1347 = vmatpush3.bf16.msra.mxu0 %v1559_v39  ;;  %1369 = vmatpush3.bf16.msra.mxu1 %v1560_v40 }
  0x8a   :  { %1348 = vmatprep.subr.bf16.mxu0 %v1561_v41  ;;  %1370 = vmatprep.subr.bf16.mxu1 %v1562_v42 }
  0x8d   :  { %1349 = vmatpush3.bf16.msra.mxu0 %v1563_v43  ;;  %1371 = vmatpush3.bf16.msra.mxu1 %v1564_v44 }
  0x8e   :  { %1350 = vmatprep.subr.bf16.mxu0 %v1565_v45  ;;  %1372 = vmatprep.subr.bf16.mxu1 %v1566_v46 }
  0x91   :  { %1351 = vmatpush3.bf16.msra.mxu0 %v1567_v47  ;;  %1373 = vmatpush3.bf16.msra.mxu1 %v1568_v48 }
  0x92   :  { %1352 = vmatprep.subr.bf16.mxu0 %v1569_v49  ;;  %1374 = vmatprep.subr.bf16.mxu1 %v1570_v50 }
  0x95   :  { %1353 = vmatpush3.bf16.msra.mxu0 %v1571_v17  ;;  %1375 = vmatpush3.bf16.msra.mxu1 %v1572_v18 }
  0x96   :  { %1354 = vmatprep.subr.bf16.mxu0 %v1573_v19  ;;  %1376 = vmatprep.subr.bf16.mxu1 %v1574_v20 }
  0x99   :  { %1355 = vmatpush3.bf16.msra.mxu0 %v1575_v21  ;;  %1377 = vmatpush3.bf16.msra.mxu1 %v1576_v22 }
  0x9a   :  { %1356 = vmatprep.subr.bf16.mxu0 %v1577_v23  ;;  %1378 = vmatprep.subr.bf16.mxu1 %v1578_v24 }
  0x9d   :  { %1357 = vmatpush3.bf16.msra.mxu0 %v1579_v25  ;;  %1379 = vmatpush3.bf16.msra.mxu1 %v1580_v26 }
  0x9e   :  { %1358 = vmatprep.subr.bf16.mxu0 %v1581_v27  ;;  %1380 = vmatprep.subr.bf16.mxu1 %v1582_v28 }
  0xa1   :  { %1359 = vmatpush3.bf16.msra.mxu0 %v1583_v29  ;;  %1381 = vmatpush3.bf16.msra.mxu1 %v1584_v30 }
  0xa2   :  { %1360 = vmatprep.subr.bf16.mxu0 %v1585_v31  ;;  %1382 = vmatprep.subr.bf16.mxu1 %v1586_v32 }
  0xa5   :  { %1361 = vmatpush3.bf16.msra.mxu0 %v1587_v33  ;;  %1383 = vmatpush3.bf16.msra.mxu1 %v1588_v34 }
 0x15b   :  { %v738_v61 = vpop.f32.mrb[0].mxu0  ;;  %v820_v62 = vpop.f32.mrb[0].mxu1 }
 0x15c   :  { %v1390_v0 = vadd.f32 %v738_v61, %v155_v58  ;;  %v740_v1 = vpop.f32.mrb[1].mxu0  ;;  %v822_v2 = vpop.f32.mrb[1].mxu1  ;;  %v1392_v3 = vadd.f32 %v820_v62, %v163_v59 }
 0x15d   :  { %v1391_v4 = vadd.f32 %v740_v1, %v159_v60  ;;  %v742_v5 = vpop.f32.mrb[2].mxu0  ;;  %v824_v6 = vpop.f32.mrb[2].mxu1  ;;  %v1393_v11 = vadd.f32 %v822_v2, %v167_v63 }
 0x15e   :  { %v827_v7 = vmul.f32 %v1390_v0, %v1390_v0  ;;  %v743_v8 = vpop.f32.mrb[3].mxu0  ;;  %v825_v9 = vpop.f32.mrb[3].mxu1  ;;  %v829_v12 = vmul.f32 %v1392_v3, %v1392_v3 }
 0x15f   :  { %v828_v10 = vmul.f32 %v1391_v4, %v1391_v4  ;;  %v830_v14 = vmul.f32 %v1393_v11, %v1393_v11 }
 0x161   :  { %v831_v13 = vadd.f32 %v828_v10, %v827_v7 }
 0x163   :  { %v832_v15 = vadd.f32 %v831_v13, %v829_v12 }
 0x165   :  { %v833_v16 = vadd.f32 %v832_v15, %v830_v14 }
 0x167   :  { %834 = vadd.xlane.f32.xlu0 %v833_v16 }
 0x1f4   :  { %v835_v35 = vpop.xlane.xlu0 %834 }
 0x1f5   :  { %v836_v36 = vmax.f32 %v835_v35, 1e-24 }
 0x1f7   :  { %1589 = vrsqrt.f32 %v836_v36 }
 0x201   :  { %v1590_v37 = vpop.eup %1589 }
 0x202   :  { %v839_v38 = vmul.f32 %v1590_v37, %v1391_v4  ;;  %v841_v39 = vmul.f32 %v1590_v37, %v1393_v11  ;;  %v838_v40 = vmul.f32 %v1590_v37, %v1390_v0  ;;  %v840_v41 = vmul.f32 %v1590_v37, %v1392_v3 }
 0x204   :  { %843 = vst [vmem:[#allocation7 + $0x8] sm:$0xff] %v839_v38  ;;  %v847_v42 = vpack.c.bf16 %v839_v38, %v839_v38  ;;  %845 = vst [vmem:[#allocation7 + $0x18] sm:$0xff] %v841_v39  ;;  %v849_v43 = vpack.c.bf16 %v841_v39, %v841_v39  ;;  %v846_v44 = vpack.c.bf16 %v838_v40, %v838_v40 }
 0x205   :  { %842 = vst [vmem:[#allocation7] sm:$0xff] %v838_v40  ;;  %v848_v45 = vpack.c.bf16 %v840_v41, %v840_v41  ;;  %844 = vst [vmem:[#allocation7 + $0x10] sm:$0xff] %v840_v41 }
 0x206   :  { %1145 = vmatprep.mubr.bf16.mxu0 %v847_v42  ;;  %1185 = vmatprep.mubr.bf16.mxu1 %v849_v43 }
 0x207   :  { %1146 = vmatmul.mubr.bf16.vlgmr.msra.gmra.mrb[4].mxu0 %v846_v44  ;;  %1186 = vmatmul.mubr.bf16.vlgmr.msra.gmra.mrb[4].mxu1 %v848_v45 }
 0x208   :  { %1646 = shalt.err (!%p1643_p6)
}
 0x209   :  { %s1647_s8 = scalar_lea.hbm %s1762_s5, 512 }
 0x20a   :  { %p1648_p7 = scmp.ne.s32.totalorder %s1762_s5, %s1647_s8  ;;  %p1651_p8 = scmp.lt.u32.totalorder %s1647_s8, %s1762_s5 }
 0x20c   :  { %p1653_p9 = pnand %p1651_p8, %p1648_p7 }
 0x20e   :  { %1656 = shalt.err (!%p1653_p9)
}
 0x20f   :  { %1203 = dma.vmem_to_hbm [thread:$0]  %s1201_s28, 512, %s1762_s5, [#allocation4]   ;;  %v1313_v48 = vld [vmem:[%s1761_s4] ss:$0 sm:$0xff] }
 0x2da   :  { %v1362_v46 = vpop.f32.mrb[4].mxu0  ;;  %v1384_v47 = vpop.f32.mrb[4].mxu1 }
 0x2db   :  { %v1363_v49 = vpop.f32.mrb[5].mxu0  ;;  %v1385_v50 = vpop.f32.mrb[5].mxu1 }
 0x2dc   :  { %v1364_v51 = vadd.f32 %v1363_v49, %v1362_v46  ;;  %v1386_v52 = vadd.f32 %v1385_v50, %v1384_v47  ;;  %v1365_v53 = vpop.f32.mrb[6].mxu0  ;;  %v1387_v54 = vpop.f32.mrb[6].mxu1 }
 0x2dd   :  { %v1366_v55 = vpop.f32.mrb[7].mxu0  ;;  %v1388_v56 = vpop.f32.mrb[7].mxu1 }
 0x2de   :  { %v1148_v57 = vadd.f32 %v1364_v51, %v1313_v48 }
 0x2e0   :  { %v1188_v58 = vadd.f32 %v1386_v52, %v1148_v57 }
 0x2e2   :  { %1193 = vst [vmem:[%s1763_s6] sm:$0xff] %v1188_v58 }
 0x2e3   :  { %1661 = dma.done.wait [#allocation4], 512  }
 0x2e4   :  { %1662 = vsyncadd [#allocation4], 4294966784 }
 0x2e5   :  { %1211 = vsyncpa [#allocation3], 1 }
 0x2e6   :  { %1212 = vsyncpa [#allocation6], 1 }
 0x2e7   :  { %1213 = vsyncpa [#allocation4], 1 }

</bundles_post_ra>
